<compile_context>
chip_gen: v7x
topology: tpu7x:2x2x1
jax: 0.10.0
libtpu: 0.0.40
codegen_flags: <defaults>
</compile_context>

<pallas_src>
import functools

import jax
import jax.numpy as jnp
from jax.experimental import pallas as pl
from jax.experimental.pallas import tpu as pltpu

EPS = 1e-5  # PyTorch nn.LayerNorm default

# Flip to True on v7x with bf16 inputs *if profiling shows vld/VALU (not DMA)
# as the saturated slot*: the two row reductions then run on the otherwise
# idle MXU (ones-vector matmuls) instead of the XLU, keeping the kernel on the
# 3.2 TB/s HBM roofline.  Left off by default (XLU reduce is plenty on
# v5e/v6e and for f32 inputs).
USE_MXU_REDUCTIONS = False


def adaln_kernel(x_ref, scale_ref, shift_ref, o_ref, *, use_mxu_reduce):
    # x_ref / o_ref: (1, TS, D) blocks.
    # scale_ref / shift_ref: full (B, D) arrays, resident in VMEM for the
    # whole grid; indexed by the batch grid coordinate.
    b = pl.program_id(0)
    x = x_ref[0].astype(jnp.float32)                          # (TS, D) f32
    d = x.shape[-1]
    inv_d = jnp.float32(1.0 / d)

    if use_mxu_reduce:
        ones = jnp.ones((d, 1), jnp.float32)
        mean = jnp.dot(x, ones, preferred_element_type=jnp.float32) * inv_d
        diff = x - mean
        var = jnp.dot(diff * diff, ones, preferred_element_type=jnp.float32) * inv_d
    else:
        mean = jnp.sum(x, axis=-1, keepdims=True) * inv_d      # (TS, 1)
        diff = x - mean
        var = jnp.sum(diff * diff, axis=-1, keepdims=True) * inv_d

    xn = diff * jax.lax.rsqrt(var + EPS)                        # (TS, D) f32

    # Epilogue (FMA + downcast) in the scale/shift dtype: bf16 on v6e/v7x for
    # bf16 inputs (halves VALU work + f32 temp footprint), f32 otherwise.
    ep = scale_ref.dtype
    scale = scale_ref[pl.ds(b, 1), :]                           # (1, D)
    shift = shift_ref[pl.ds(b, 1), :]
    out = xn.astype(ep) * scale + shift                         # broadcast (1, D)
    o_ref[0] = out.astype(o_ref.dtype)


def _round_up(n, m):
    return ((n + m - 1) // m) * m


def _sublane_align(itemsize):
    # Packed-sublane row counts: f32 vreg [8,128], bf16 [16,128], int8/fp8 [32,128].
    return {1: 32, 2: 16}.get(int(itemsize), 8)


def _vmem_capacity_bytes():
    try:
        cap = int(pltpu.get_tpu_info().vmem_capacity_bytes)
    except Exception:
        cap = 64 << 20  # conservative: v7x per-TensorCore VMEM
    return max(64 << 20, min(cap, 128 << 20))


def _native_bf16_vpu():
    # v6e/v7x have native bf16 VALU; v5 and older do not.
    try:
        kind = jax.devices()[0].device_kind.lower()
        return not any(g in kind for g in ("v2", "v3", "v4", "v5"))
    except Exception:
        return True


def _pick_seq_tile(S, D, itemsize, vmem_cap):
    """Largest sublane-aligned row count whose working set fits the VMEM budget."""
    align = _sublane_align(itemsize)
    # Bytes per sequence row in the kernel working set:
    #   in + out, double-buffered, at the I/O dtype  -> 2 * 2 * D * itemsize
    #   ~3 full-tile f32 temporaries (x upcast, diff, xn) -> 3 * D * 4
    per_row = 2 * 2 * D * itemsize + 3 * D * 4
    budget = max(vmem_cap // 2, 4 << 20)          # leave ~half of VMEM headroom
    ts_budget = budget // per_row
    # Byte-driven input-tile target (~8 MiB of input bytes); on v7x the VMEM
    # budget above is the binding constraint, on v5e/v6e this cap binds.
    ts_target = (8 << 20) // max(1, D * itemsize)
    ts = min(ts_budget, ts_target)
    ts = max(align, (ts // align) * align)
    # Never exceed the alignment-rounded sequence length (single ragged block).
    return min(ts, _round_up(S, align))


def ada_layer_norm(x, cond, w_gamma, b_gamma, w_beta, b_beta, ln_w, ln_b):
    """x: (B, S, D), cond: (B, C), w_*: (D, C) in torch nn.Linear layout."""
    B, S, D = x.shape
    # TODO(synk): for full-rate (unmasked) vector stores D should be a multiple
    # of 128 lanes; for small D one would pack 128//D sequence rows per lane row
    # and do a segmented reduction.  Not done here to keep LayerNorm-over-D exact.

    # ---- hoisted conditioning: one well-shaped (B, C) @ (C, 2D) matmul ----
    cond_f32 = cond.astype(jnp.float32)
    w_cat = jnp.concatenate([w_gamma.T, w_beta.T], axis=-1).astype(jnp.float32)  # (C, 2D)
    b_cat = jnp.concatenate([b_gamma, b_beta]).astype(jnp.float32)               # (2D,)
    gb = cond_f32 @ w_cat + b_cat                                                # (B, 2D)
    gamma, beta = gb[:, :D], gb[:, D:]

    # Fold the LN elementwise affine into the FiLM scale/shift (one FMA/elem).
    lnw = ln_w.astype(jnp.float32)
    lnb = ln_b.astype(jnp.float32)
    scale = (1.0 + gamma) * lnw                      # (B, D)
    shift = (1.0 + gamma) * lnb + beta               # (B, D)

    # Epilogue dtype: bf16 on chips with native bf16 VPU for bf16 inputs,
    # f32 everywhere else (v5e has no bf16 VALU).
    if x.dtype == jnp.bfloat16 and _native_bf16_vpu():
        ep_dtype = jnp.bfloat16
    else:
        ep_dtype = jnp.float32
    scale = scale.astype(ep_dtype)
    shift = shift.astype(ep_dtype)

    # ---- sequence tiling (byte-driven, dtype-aware sublane alignment) ----
    itemsize = jnp.dtype(x.dtype).itemsize
    vmem_cap = _vmem_capacity_bytes()
    ts = _pick_seq_tile(S, D, itemsize, vmem_cap)
    align = _sublane_align(itemsize)
    n_s = pl.cdiv(S, ts)
    # v7x: 2 TensorCores shard the "parallel" axes -- ensure >= 2 grid steps
    # when the problem is big enough to split (no-op on v5e/v6e).
    if B * n_s < 2 and ts > align:
        ts = max(align, _round_up(pl.cdiv(S, 2), align))
        n_s = pl.cdiv(S, ts)
    grid = (B, n_s)

    # Honest VMEM accounting: double-buffered I/O + f32 temporaries + the
    # resident scale/shift arrays, with margin, capped below physical VMEM.
    tile_io = ts * D * itemsize
    working = (2 * 2 * tile_io
               + 3 * ts * D * 4
               + 2 * B * D * jnp.dtype(ep_dtype).itemsize)
    vmem_limit = int(min(vmem_cap - (8 << 20), max(32 << 20, working + (8 << 20))))

    grid_spec = pltpu.PrefetchScalarGridSpec(
        num_scalar_prefetch=0,
        grid=grid,
        in_specs=[
            pl.BlockSpec((1, ts, D), lambda b, s: (b, s, 0)),        # x tile
            pl.BlockSpec(memory_space=pltpu.MemorySpace.VMEM),       # scale (B, D), resident
            pl.BlockSpec(memory_space=pltpu.MemorySpace.VMEM),       # shift (B, D), resident
        ],
        out_specs=pl.BlockSpec((1, ts, D), lambda b, s: (b, s, 0)),
    )

    kernel = functools.partial(adaln_kernel, use_mxu_reduce=USE_MXU_REDUCTIONS)
    return pl.pallas_call(
        kernel,
        out_shape=jax.ShapeDtypeStruct((B, S, D), x.dtype),
        grid_spec=grid_spec,
        compiler_params=pltpu.CompilerParams(
            dimension_semantics=("parallel", "parallel"),
            vmem_limit_bytes=vmem_limit,
        ),
    )(x, scale, shift)


def ada_layer_norm_ref(x, cond, w_gamma, b_gamma, w_beta, b_beta, ln_w, ln_b):
    mean = jnp.mean(x, axis=-1, keepdims=True)
    var = jnp.mean((x - mean) ** 2, axis=-1, keepdims=True)
    xn = (x - mean) / jnp.sqrt(var + EPS) * ln_w + ln_b
    gamma = (cond @ w_gamma.T + b_gamma)[:, None, :]
    beta = (cond @ w_beta.T + b_beta)[:, None, :]
    return xn * (1 + gamma) + beta


if __name__ == "__main__":
    B, S, D, C = 2, 8, 32, 16   # batch, seq, normalized_shape, cond_dim

    key = jax.random.PRNGKey(0)
    k_x, k_c, k_wg, k_bg, k_wb, k_bb, k_lw, k_lb = jax.random.split(key, 8)

    x = jax.random.normal(k_x, (B, S, D), dtype=jnp.float32)
    cond = jax.random.normal(k_c, (B, C), dtype=jnp.float32)

    # torch Linear layout: weight (out_features, in_features) = (D, C)
    bound = 1.0 / (C ** 0.5)
    w_gamma = jax.random.uniform(k_wg, (D, C), jnp.float32, -bound, bound)
    b_gamma = jax.random.uniform(k_bg, (D,), jnp.float32, -bound, bound)
    w_beta = jax.random.uniform(k_wb, (D, C), jnp.float32, -bound, bound)
    b_beta = jax.random.uniform(k_bb, (D,), jnp.float32, -bound, bound)
    # Non-trivial LN affine to exercise the scale/shift fold.
    ln_w = 1.0 + 0.1 * jax.random.normal(k_lw, (D,), jnp.float32)
    ln_b = 0.1 * jax.random.normal(k_lb, (D,), jnp.float32)

    out = ada_layer_norm(x, cond, w_gamma, b_gamma, w_beta, b_beta, ln_w, ln_b)
    out = jax.block_until_ready(out)

    ref = ada_layer_norm_ref(x, cond, w_gamma, b_gamma, w_beta, b_beta, ln_w, ln_b)
    assert out.shape == (B, S, D)
    assert out.dtype == x.dtype
    err = float(jnp.max(jnp.abs(out - ref)))
    assert err < 2e-5, f"max abs err {err}"

    print("KERNEL_OK")
</pallas_src>

<mosaic_0001>
module attributes {stable_mosaic.version = 11 : i64} {
  func.func @adaln_kernel(%arg0: i32, %arg1: i32, %arg2: memref<1x8x32xf32, #tpu.memory_space<vmem>>, %arg3: memref<2x32xf32, #tpu.memory_space<vmem>>, %arg4: memref<2x32xf32, #tpu.memory_space<vmem>>, %arg5: memref<1x8x32xf32, #tpu.memory_space<vmem>>) attributes {dimension_semantics = [#tpu.dimension_semantics<parallel>, #tpu.dimension_semantics<parallel>], iteration_bounds = array<i64: 2, 1>, scalar_prefetch = 0 : i64, scratch_operands = 0 : i64, tpu.core_type = #tpu.core_type<tc>, window_params = [{transform_indices = @transform_0, window_bounds = array<i64: 1, 8, 32>}, {pipeline_mode = #tpu.pipeline_mode<synchronous>, transform_indices = @transform_1, window_bounds = array<i64: 2, 32>}, {pipeline_mode = #tpu.pipeline_mode<synchronous>, transform_indices = @transform_2, window_bounds = array<i64: 2, 32>}, {transform_indices = @transform_3, window_bounds = array<i64: 1, 8, 32>}]} {
    %c0 = arith.constant 0 : index
    %c0_0 = arith.constant 0 : index
    %c0_1 = arith.constant 0 : index
    %0 = vector.load %arg2[%c0, %c0_0, %c0_1] : memref<1x8x32xf32, #tpu.memory_space<vmem>>, vector<1x8x32xf32>
    %1 = vector.shape_cast %0 : vector<1x8x32xf32> to vector<8x32xf32>
    %cst = arith.constant dense<0.000000e+00> : vector<8xf32>
    %2 = vector.multi_reduction <add>, %1, %cst [1] : vector<8x32xf32> to vector<8xf32>
    %3 = vector.shape_cast %2 : vector<8xf32> to vector<8x1xf32>
    %cst_2 = arith.constant 3.125000e-02 : f32
    %4 = vector.broadcast %cst_2 : f32 to vector<8x1xf32>
    %5 = arith.mulf %3, %4 : vector<8x1xf32>
    %6 = vector.broadcast %5 : vector<8x1xf32> to vector<8x32xf32>
    %7 = arith.subf %1, %6 : vector<8x32xf32>
    %8 = arith.mulf %7, %7 : vector<8x32xf32>
    %cst_3 = arith.constant dense<0.000000e+00> : vector<8xf32>
    %9 = vector.multi_reduction <add>, %8, %cst_3 [1] : vector<8x32xf32> to vector<8xf32>
    %10 = vector.shape_cast %9 : vector<8xf32> to vector<8x1xf32>
    %cst_4 = arith.constant 3.125000e-02 : f32
    %11 = vector.broadcast %cst_4 : f32 to vector<8x1xf32>
    %12 = arith.mulf %10, %11 : vector<8x1xf32>
    %cst_5 = arith.constant 9.99999974E-6 : f32
    %13 = vector.broadcast %cst_5 : f32 to vector<8x1xf32>
    %14 = arith.addf %12, %13 : vector<8x1xf32>
    %15 = math.rsqrt %14 : vector<8x1xf32>
    %16 = vector.broadcast %15 : vector<8x1xf32> to vector<8x32xf32>
    %17 = arith.mulf %7, %16 : vector<8x32xf32>
    %18 = arith.index_cast %arg0 : i32 to index
    %c0_6 = arith.constant 0 : index
    %19 = vector.load %arg3[%18, %c0_6] : memref<2x32xf32, #tpu.memory_space<vmem>>, vector<1x32xf32>
    %20 = arith.index_cast %arg0 : i32 to index
    %c0_7 = arith.constant 0 : index
    %21 = vector.load %arg4[%20, %c0_7] : memref<2x32xf32, #tpu.memory_space<vmem>>, vector<1x32xf32>
    %22 = vector.broadcast %19 : vector<1x32xf32> to vector<8x32xf32>
    %23 = arith.mulf %17, %22 : vector<8x32xf32>
    %24 = vector.broadcast %21 : vector<1x32xf32> to vector<8x32xf32>
    %25 = arith.addf %23, %24 : vector<8x32xf32>
    %c0_8 = arith.constant 0 : index
    %c0_9 = arith.constant 0 : index
    %c0_10 = arith.constant 0 : index
    %26 = vector.load %arg5[%c0_8, %c0_9, %c0_10] : memref<1x8x32xf32, #tpu.memory_space<vmem>>, vector<1x8x32xf32>
    %27 = vector.shape_cast %26 : vector<1x8x32xf32> to vector<8x32xf32>
    %28 = vector.shape_cast %25 : vector<8x32xf32> to vector<1x8x32xf32>
    tpu.vector_store %arg5[%c0_8, %c0_9, %c0_10], %28 {strides = array<i32>} : memref<1x8x32xf32, #tpu.memory_space<vmem>>, vector<1x8x32xf32>,
    return
  }
  func.func @transform_0(%arg0: i32, %arg1: i32) -> (i32, i32, i32) {
    %c0_i32 = arith.constant 0 : i32
    %c0_i32_0 = arith.constant 0 : i32
    return %arg0, %arg1, %c0_i32 : i32, i32, i32
  }
  func.func @transform_1(%arg0: i32, %arg1: i32) -> (i32, i32) {
    %c0_i32 = arith.constant 0 : i32
    %c0_i32_0 = arith.constant 0 : i32
    %c0_i32_1 = arith.constant 0 : i32
    return %c0_i32, %c0_i32_0 : i32, i32
  }
  func.func @transform_2(%arg0: i32, %arg1: i32) -> (i32, i32) {
    %c0_i32 = arith.constant 0 : i32
    %c0_i32_0 = arith.constant 0 : i32
    %c0_i32_1 = arith.constant 0 : i32
    return %c0_i32, %c0_i32_0 : i32, i32
  }
  func.func @transform_3(%arg0: i32, %arg1: i32) -> (i32, i32, i32) {
    %c0_i32 = arith.constant 0 : i32
    %c0_i32_0 = arith.constant 0 : i32
    return %arg0, %arg1, %c0_i32 : i32, i32, i32
  }
}

</mosaic_0001>

<bundles_post_ra>
// kernel: tpu_custom_call.1
= control target key start
LH: loop header
LB: loop body
LE: loop exit
PB: predicated region body
PF: predicated region fallthrough
CT: control target
= control target key end

     0   :  { %8 = vsyncpa [#allocation3], 0  ;;  %s728_s0 = inlined_call_operand.hbm [shape: f32[2,8,32], index: 0, kind: input, shape index: {}]   ;;  %s729_s1 = inlined_call_operand.vmem [shape: f32[2,32], index: 1, kind: input, shape index: {}]   ;;  %s730_s2 = inlined_call_operand.vmem [shape: f32[2,32], index: 2, kind: input, shape index: {}]   ;;  %s731_s3 = inlined_call_operand.hbm [shape: f32[2,8,32], index: 3, kind: output, shape index: {}]  }
   0x1   :  { %10 = vsyncpa [#allocation3 + $0x1], 0 }
   0x2   :  { %11 = vsyncpa [#allocation4], 0 }
   0x3   :  { %13 = vsyncpa [#allocation4 + $0x1], 0  ;;  %s545_s12 = smov 0   ;;  %s547_s13 = smov 0  }
   0x4   :  { %s549_s14 = smov 0   ;;  %s551_s15 = smov 0  }
   0x5   :  { %s553_s16 = smov 0   ;;  %s555_s17 = smov 0  }
   0x6 LB: > { %s330_s18 = sadd.s32 4294967295, %s521_s17   ;;  %s331_s19 = sadd.s32 4294967294, %s521_s17   ;;  %s521_s17 = sphi %s555_s17, %s19_s17   ;;  %s517_s16 = sphi %s553_s16, %s747_s16   ;;  %s513_s15 = sphi %s551_s15, %s746_s15   ;;  %s509_s14 = sphi %s549_s14, %s745_s14   ;;  %s505_s13 = sphi %s547_s13, %s744_s13   ;;  %s501_s12 = sphi %s545_s12, %s743_s12  }
   0x7   : > { %s31_s20 = sadd.s32 1, %s517_s16  ;;  %s40_s21 = sadd.s32 1, %s509_s14 }
   0x8   : > { %p33_p0 = scmp.ge.s32.totalorder %s31_s20, 2  ;;  %p47_p1 = scmp.ne.s32.totalorder %s509_s14, %s505_s13 }
   0x9   : > { %p48_p2 = scmp.eq.s32.totalorder %s521_s17, 0  ;;  %p53_p3 = scmp.ne.s32.totalorder %s505_s13, %s501_s12 }
   0xa   : > { %s749_s20 = smov (%p33_p0, %s31_s20), 0  ;;  %p54_p5 = scmp.eq.s32.totalorder %s330_s18, 0 }
   0xb   : > { %p586_p4 = por %p48_p2, %p47_p1  ;;  %s35_s23 = ssub.s32 %s517_s16, %s749_s20 }
   0xc   : > { %p121_p6 = scmp.eq.s32.totalorder %s330_s18, 1  ;;  %p38_p7 = scmp.eq.s32.totalorder %s35_s23, 0 }
   0xd   : > { %p592_p8 = por %p54_p5, %p53_p3  ;;  %p127_p10 = scmp.eq.s32.totalorder %s331_s19, 1 }
   0xe   : > { %p596_p9 = por %p121_p6, %p47_p1  ;;  %p357_p13 = scmp.lt.s32.totalorder %s521_s17, 2 }
   0xf   : > { %s601_s26 = scalar_select %p38_p7, %s509_s14, %s40_s21  }
  0x10   : > { %s735_s25 = scalar_select %p596_p9, 1, 0 }
  0x11   : > { %p603_p11 = por %p127_p10, %p53_p3  ;;  %s153_s28 = sand.u32 1, %s509_s14  }
  0x12   : > { %s334_s29 = sshll.u32 %s153_s28, 3  ;;  %s335_s30 = sshll.u32 %s517_s16, 7 }
  0x13   : > { %s736_s27 = scalar_select %p603_p11, 1, 0 }
  0x14   : > { %s614_s6 = scalar_lea.hbm %s728_s0, %s335_s30  ;;  %s157_s7 = scalar_lea.vmem [#allocation2], %s334_s29 }
  0x15   : > { %s165_s8 = sshll.u32 %s157_s7, 4  ;;  %p620_p0 = pnand %p357_p13, %p586_p4  ;;  %s616_s8 = int_to_ptr.vmem [resolvable:$true] %s165_s8 }
  0x16   : > { %s154_s10 = scalar_lea.sflag [#allocation3], %s153_s28  ;;  %s409_s11 = scalar_lea.hbm %s614_s6, 128 }
  0x17   : > { %p410_p3 = scmp.ne.s32.totalorder %s614_s6, %s409_s11  ;;  %p411_p5 = pneg %p620_p0 }
  0x18   : > { %s414_s21 = scalar_lea.hbm %s728_s0, 256  ;;  %p415_p4 = scmp.lt.u32.totalorder %s614_s6, %s728_s0 }
  0x19   : > { %p412_p6 = pnand %p411_p5, %p410_p3  ;;  %p416_p10 = scmp.lt.u32.totalorder %s414_s21, %s409_s11 }
  0x1a   : > { %p418_p12 = scmp.lt.u32.totalorder %s409_s11, %s614_s6 }
  0x1b   : > { %p413_p7 = pneg %p412_p6  ;;  %p417_p13 = por %p416_p10, %p415_p4 }
  0x1d   : > { %p419_p1 = por %p418_p12, %p417_p13 }
  0x1f   : > { %p420_p2 = pnand %p419_p1, %p413_p7 }
  0x21   : > { %423 = shalt.err (!%p420_p2)
}
  0x22   : > { %s424_s28 = scalar_lea.vmem %s616_s8, 128  ;;  %s523_s29 = smov [#allocation2]  }
  0x23   : > { %p425_p3 = scmp.ne.s32.totalorder %s616_s8, %s424_s28  ;;  %s429_s30 = sshll.u32 %s523_s29, 4  ;;  %s430_s30 = int_to_ptr.vmem [resolvable:$false] %s429_s30 }
  0x24   : > { %s431_s4 = scalar_lea.vmem %s430_s30, 256  ;;  %p432_p9 = scmp.lt.s32.totalorder %s616_s8, %s430_s30 }
  0x25   : > { %p427_p6 = pnand %p425_p3, %p411_p5  ;;  %p433_p4 = scmp.lt.s32.totalorder %s431_s4, %s424_s28 }
  0x27   : > { %p428_p11 = pneg %p427_p6  ;;  %p434_p10 = por %p433_p4, %p432_p9 }
  0x29   : > { %p435_p12 = pnand %p434_p10, %p428_p11 }
  0x2b   : > { %438 = shalt.err (!%p435_p12)
}
  0x2c   : > { %352 = dma.hbm_to_vmem [thread:$0]  (!%p620_p0), %s614_s6, 128, %s616_s8, %s154_s10  }
  0x2d   : > { %p738_p1 = scmp.lt.s32.totalorder %s521_s17, 3  ;;  %p739_p2 = scmp.ge.s32.totalorder %s521_s17, 1 }
  0x2f   : > { %p171_p5 = pnand %p739_p2, %p738_p1 }
  0x30   : > { %s656_s5 = sand.u32 (!%p171_p5), 1, %s505_s13  }
  0x31   : > { %174 = sbr.rel (%p171_p5) target bundleno = 385 (0x181), region = 32  ;;  %s337_s7 = sshll.u32 (!%p171_p5), %s656_s5, 3 }
  0x32   : > { %s177_s11 = scalar_lea.sflag (!%p171_p5), [#allocation3], %s656_s5  ;;  %s180_s18 = scalar_lea.vmem (!%p171_p5), [#allocation2], %s337_s7 }
  0x38   : > { %492 = dma.done.wait (%p592_p8), %s177_s11, 128  }
  0x39   : > { %494 = vsyncadd (%p592_p8), %s177_s11, 4294967168  ;;  %vm204_vm0 = vcmask 261120   ;;  %v203_v0 = vld [vmem:[%s180_s18] sm:$0xff]  ;;  %s218_s8 = scalar_lea.vmem %s729_s1, %s513_s15  ;;  %s220_s19 = scalar_lea.vmem %s730_s2, %s513_s15 }
  0x3a   : > { %v205_v1 = vsel %vm204_vm0, %v203_v0, 0.0  ;;  %v339_v11 = vld [vmem:[%s218_s8] ss:$0 sm:$0xff]  ;;  %s342_s21 = sshll.u32 %s513_s15, 7  ;;  %s202_s22 = scalar_lea.vmem [#allocation5], %s337_s7 }
  0x3b   : > { %206 = vadd.xlane.f32.xlu0 %v205_v1  ;;  %v340_v13 = vld [vmem:[%s220_s19] ss:$0 sm:$0xff]  ;;  %s248_s23 = sshll.u32 %s202_s22, 4  ;;  %s678_s30 = scalar_lea.hbm %s731_s3, %s342_s21  ;;  %s680_s23 = int_to_ptr.vmem [resolvable:$true] %s248_s23 }
  0x3c   : > { %s234_s4 = scalar_lea.sflag [#allocation4], %s656_s5  ;;  %s439_s11 = scalar_lea.vmem %s680_s23, 128 }
  0x3d   : > { %p440_p8 = scmp.ne.s32.totalorder %s680_s23, %s439_s11  ;;  %p740_p9 = scmp.ne.s32.totalorder %s735_s25, 0 }
  0x3e   : > { %s524_s15 = smov [#allocation5]  }
  0x3f   : > { %p441_p11 = pnand %p440_p8, %p740_p9  ;;  %s443_s7 = sshll.u32 %s524_s15, 4  ;;  %s444_s7 = int_to_ptr.vmem [resolvable:$false] %s443_s7 }
  0x40   : > { %s445_s18 = scalar_lea.vmem %s444_s7, 256  ;;  %p446_p7 = scmp.lt.s32.totalorder %s680_s23, %s444_s7 }
  0x41   : > { %p442_p0 = pneg %p441_p11  ;;  %p447_p13 = scmp.lt.s32.totalorder %s445_s18, %s439_s11 }
  0x43   : > { %p448_p3 = por %p447_p13, %p446_p7 }
  0x45   : > { %p449_p6 = pnand %p448_p3, %p442_p0 }
  0xc8   : > { %v207_v2 = vpop.xlane.xlu0 %206 }
  0xc9   : > { %v208_v3 = vmul.f32 0.03125, %v207_v2 }
  0xcb   : > { %v209_v4 = vsub.f32 %v203_v0, %v208_v3 }
  0xcd   : > { %v210_v5 = vmul.f32 %v209_v4, %v209_v4 }
  0xcf   : > { %v211_v6 = vsel %vm204_vm0, %v210_v5, 0.0 }
  0xd0   : > { %212 = vadd.xlane.f32.xlu0 %v211_v6 }
 0x15d   : > { %v213_v7 = vpop.xlane.xlu0 %212 }
 0x15e   : > { %v214_v8 = vmul.f32 0.03125, %v213_v7 }
 0x160   : > { %v215_v9 = vadd.f32 1e-05, %v214_v8 }
 0x162   : > { %407 = vrsqrt.f32 %v215_v9 }
 0x16c   : > { %v408_v10 = vpop.eup %407 }
 0x16d   : > { %v217_v12 = vmul.f32 %v408_v10, %v209_v4 }
 0x16f   : > { %v226_v14 = vmul.f32 %v339_v11, %v217_v12 }
 0x171   : > { %v231_v15 = vadd.f32 %v340_v13, %v226_v14 }
 0x173   : > { %232 = vst.msk [vmem:[%s202_s22] sm:$0xff] %vm204_vm0, %v231_v15 }
 0x174   : > { %452 = shalt.err (!%p449_p6)
}
 0x175   : > { %s453_s5 = scalar_lea.hbm %s678_s30, 128  ;;  %s457_s8 = scalar_lea.hbm %s731_s3, 256 }
 0x176   : > { %p454_p4 = scmp.ne.s32.totalorder %s678_s30, %s453_s5  ;;  %p458_p1 = scmp.lt.u32.totalorder %s678_s30, %s731_s3 }
 0x177   : > { %p459_p2 = scmp.lt.u32.totalorder %s457_s8, %s453_s5  ;;  %p461_p8 = scmp.lt.u32.totalorder %s453_s5, %s678_s30 }
 0x178   : > { %p455_p10 = pnand %p454_p4, %p740_p9 }
 0x179   : > { %p460_p5 = por %p459_p2, %p458_p1 }
 0x17a   : > { %p456_p12 = pneg %p455_p10 }
 0x17b   : > { %p462_p11 = por %p461_p8, %p460_p5 }
 0x17d   : > { %p463_p0 = pnand %p462_p11, %p456_p12 }
 0x17f   : > { %466 = shalt.err (!%p463_p0)
}
 0x180   : > { %347 = dma.vmem_to_hbm [thread:$0]  (%p740_p9), %s680_s23, 128, %s678_s30, %s234_s4  }
 0x181 PF: > { %s260_s19 = sand.u32 1, %s501_s12   ;;  %p741_p7 = scmp.ne.s32.totalorder %s736_s27, 0 }
 0x182   : > { %p742_p13 = scmp.ge.s32.totalorder %s521_s17, 2  ;;  %s261_s21 = scalar_lea.sflag [#allocation4], %s260_s19 }
 0x184   : > { %p354_p3 = pnand %p742_p13, %p741_p7 }
 0x186   : > { %496 = dma.done.wait (!%p354_p3), %s261_s21, 128  }
 0x187   : > { %498 = vsyncadd (!%p354_p3), %s261_s21, 4294967168  ;;  %s19_s17 = sadd.s32 1, %s521_s17   ;;  %s743_s12 = smov %s505_s13 }
 0x188   : > { %p16_p6 = scmp.ge.s32.totalorder %s19_s17, 4   ;;  %s744_s13 = smov %s509_s14 }
 0x189   : > { %s745_s14 = smov %s601_s26  ;;  %s746_s15 = smov %s517_s16 }
 0x18a   : > { %s747_s16 = smov %s749_s20  ;;  %18 = sbr.rel (!%p16_p6) target bundleno = 6 (0x6), region = 79 }
 0x191   :  { %266 = vsyncpa [#allocation3], 1 }
 0x192   :  { %268 = vsyncpa [#allocation3 + $0x1], 1 }
 0x193   :  { %269 = vsyncpa [#allocation4], 1 }
 0x194   :  { %271 = vsyncpa [#allocation4 + $0x1], 1 }

</bundles_post_ra>
